<compile_context>
chip_gen: v6e
topology: v6e:2x2x1
jax: 0.10.0
libtpu: 0.0.40
codegen_flags: <defaults>
</compile_context>

<pallas_src>
import functools

import jax
import jax.numpy as jnp
from jax.experimental import pallas as pl
from jax.experimental.pallas import tpu as pltpu


def _round_up(x: int, m: int) -> int:
    return ((x + m - 1) // m) * m


def _fused_qkv_kernel(x_ref, w_ref, b_ref, o_ref):
    """One (tm, F) x (F, tn) MXU matmul over the fused Q|K|V output columns.

    f32 accumulation, single f32 bias add, then cast to the output dtype.
    The output tile's last dim is a multiple of 128 -> unmasked lane-dense
    stores.
    """
    acc = jnp.dot(x_ref[...], w_ref[...], preferred_element_type=jnp.float32)
    o_ref[...] = (acc + b_ref[...]).astype(o_ref.dtype)


@functools.partial(jax.jit, static_argnames=("tm", "tn"))
def composite_qkv_map(x, wq, bq, wk, bk, wv, bv, *, tm=256, tn=512):
    """CompositeQKVmap forward.

    x  : (B, S, F)
    wq : (F, Q), bq : (1, Q)   -- q_map
    wk : (F, K), bk : (1, K)   -- kv_map.k_map
    wv : (F, V), bv : (1, V)   -- kv_map.v_map
    returns (q, k, v) of shapes (B, S, Q), (B, S, K), (B, S, V)
    """
    B, S, F = x.shape
    Q = wq.shape[1]
    K = wk.shape[1]
    V = wv.shape[1]
    M = B * S
    N = Q + K + V
    itemsize = jnp.dtype(x.dtype).itemsize

    # Fuse the three projections into one weight / bias (done once per call in
    # the wrapper; under jit this folds into the parameter layout).
    w = jnp.concatenate([wq, wk, wv], axis=1)   # (F, N)
    b = jnp.concatenate([bq, bk, bv], axis=1)   # (1, N)

    # --- Tile sizing -------------------------------------------------------
    # Row tile: as large as possible up to `tm`, multiple of 16 (safe for both
    # f32 (8,128) and bf16 (16,128) sublane packing).  Pad M instead of
    # asserting divisibility.
    tm_eff = min(tm, _round_up(M, 16))
    tm_eff = _round_up(tm_eff, 16)
    M_pad = _round_up(M, tm_eff)

    # Output-column tile: lane-dense (multiple of 128), up to `tn`.
    tn_eff = min(tn, _round_up(N, 128))
    tn_eff = _round_up(tn_eff, 128)
    N_pad = _round_up(N, tn_eff)

    x2d = x.reshape(M, F)
    if M_pad != M:
        x2d = jnp.pad(x2d, ((0, M_pad - M), (0, 0)))
    if N_pad != N:
        w = jnp.pad(w, ((0, 0), (0, N_pad - N)))
        b = jnp.pad(b, ((0, 0), (0, N_pad - N)))

    grid = (M_pad // tm_eff, N_pad // tn_eff)

    # --- VMEM budget (double-buffered inputs/outputs + f32 headroom) -------
    vmem_bytes = 2 * (
        tm_eff * F * itemsize        # x tile
        + F * tn_eff * itemsize      # weight slab
        + 1 * tn_eff * itemsize      # bias slab
        + tm_eff * tn_eff * itemsize # output tile
    ) + tm_eff * tn_eff * 4          # f32 accumulator headroom
    vmem_limit = int(min(max(int(vmem_bytes * 1.5), 32 << 20), 64 << 20))

    cost = pl.CostEstimate(
        flops=2 * M_pad * F * N_pad,
        transcendentals=0,
        bytes_accessed=int(
            (M_pad * F + F * N_pad + N_pad + M_pad * N_pad) * itemsize
        ),
    )

    out2d = pl.pallas_call(
        _fused_qkv_kernel,
        out_shape=jax.ShapeDtypeStruct((M_pad, N_pad), x.dtype),
        grid_spec=pltpu.PrefetchScalarGridSpec(
            num_scalar_prefetch=0,
            grid=grid,
            in_specs=[
                # x tile: varies with row index i, full F.
                pl.BlockSpec((tm_eff, F), lambda i, j: (i, 0)),
                # weight slab: varies only with column index j (resident
                # across the M axis).
                pl.BlockSpec((F, tn_eff), lambda i, j: (0, j)),
                # bias slab.
                pl.BlockSpec((1, tn_eff), lambda i, j: (0, j)),
            ],
            out_specs=pl.BlockSpec((tm_eff, tn_eff), lambda i, j: (i, j)),
        ),
        compiler_params=pltpu.CompilerParams(
            dimension_semantics=("parallel", "parallel"),
            vmem_limit_bytes=vmem_limit,
        ),
        cost_estimate=cost,
    )(x2d, w, b)

    # Strip padding and split the fused output back into q / k / v.
    out2d = out2d[:M]
    q = out2d[:, :Q].reshape(B, S, Q)
    k = out2d[:, Q:Q + K].reshape(B, S, K)
    v = out2d[:, Q + K:Q + K + V].reshape(B, S, V)
    return q, k, v


def _reference(x, wq, bq, wk, bk, wv, bv):
    """Pure-JAX reference mirroring CompositeQKVmap.forward."""
    q = jnp.einsum("bsf,fq->bsq", x, wq) + bq[0]
    k = jnp.einsum("bsf,fk->bsk", x, wk) + bk[0]
    v = jnp.einsum("bsf,fv->bsv", x, wv) + bv[0]
    return q, k, v


if __name__ == "__main__":
    # Small shapes consistent with the module's (*, S, F) -> (*, S, {Q,K,V}).
    B, S, F = 2, 8, 32        # batch, sequence, input_features
    Qf, Kf, Vf = 32, 32, 32   # q_features, k_features, v_features

    key = jax.random.PRNGKey(0)
    kx, kq, kk, kv, kbq, kbk, kbv = jax.random.split(key, 7)

    x = jax.random.normal(kx, (B, S, F), dtype=jnp.float32)

    # Deterministic synthetic parameters (not a checkpoint).
    scale = 1.0 / jnp.sqrt(jnp.float32(F))
    wq = jax.random.normal(kq, (F, Qf), dtype=jnp.float32) * scale
    wk = jax.random.normal(kk, (F, Kf), dtype=jnp.float32) * scale
    wv = jax.random.normal(kv, (F, Vf), dtype=jnp.float32) * scale
    bq = jax.random.normal(kbq, (1, Qf), dtype=jnp.float32) * 0.01
    bk = jax.random.normal(kbk, (1, Kf), dtype=jnp.float32) * 0.01
    bv = jax.random.normal(kbv, (1, Vf), dtype=jnp.float32) * 0.01

    q, k, v = composite_qkv_map(x, wq, bq, wk, bk, wv, bv)
    jax.block_until_ready((q, k, v))

    q_ref, k_ref, v_ref = _reference(x, wq, bq, wk, bk, wv, bv)
    assert q.shape == (B, S, Qf) and k.shape == (B, S, Kf) and v.shape == (B, S, Vf)
    assert jnp.allclose(q, q_ref, atol=1e-5, rtol=1e-5)
    assert jnp.allclose(k, k_ref, atol=1e-5, rtol=1e-5)
    assert jnp.allclose(v, v_ref, atol=1e-5, rtol=1e-5)

    print("KERNEL_OK")
</pallas_src>

<mosaic_0001>
module attributes {stable_mosaic.version = 11 : i64} {
  func.func @_fused_qkv_kernel(%arg0: i32, %arg1: i32, %arg2: memref<16x32xf32, #tpu.memory_space<vmem>>, %arg3: memref<32x128xf32, #tpu.memory_space<vmem>>, %arg4: memref<1x128xf32, #tpu.memory_space<vmem>>, %arg5: memref<16x128xf32, #tpu.memory_space<vmem>>) attributes {dimension_semantics = [#tpu.dimension_semantics<parallel>, #tpu.dimension_semantics<parallel>], iteration_bounds = array<i64: 1, 1>, scalar_prefetch = 0 : i64, scratch_operands = 0 : i64, tpu.core_type = #tpu.core_type<tc>, window_params = [{transform_indices = @transform_0, window_bounds = array<i64: 16, 32>}, {transform_indices = @transform_1, window_bounds = array<i64: 32, 128>}, {transform_indices = @transform_2, window_bounds = array<i64: 1, 128>}, {transform_indices = @transform_3, window_bounds = array<i64: 16, 128>}]} {
    %c0 = arith.constant 0 : index
    %c0_0 = arith.constant 0 : index
    %0 = vector.load %arg2[%c0, %c0_0] : memref<16x32xf32, #tpu.memory_space<vmem>>, vector<16x32xf32>
    %c0_1 = arith.constant 0 : index
    %c0_2 = arith.constant 0 : index
    %1 = vector.load %arg3[%c0_1, %c0_2] : memref<32x128xf32, #tpu.memory_space<vmem>>, vector<32x128xf32>
    %cst = arith.constant dense<0.000000e+00> : vector<16x128xf32>
    %2 = tpu.matmul %0, %1, %cst {dimension_numbers = #tpu.dot_dimension_numbers<[1], [0], [0], [1], [0, 0, 1, 1], [], []>} : vector<16x32xf32>, vector<32x128xf32>, vector<16x128xf32> -> vector<16x128xf32>
    %c0_3 = arith.constant 0 : index
    %c0_4 = arith.constant 0 : index
    %3 = vector.load %arg4[%c0_3, %c0_4] : memref<1x128xf32, #tpu.memory_space<vmem>>, vector<1x128xf32>
    %4 = vector.broadcast %3 : vector<1x128xf32> to vector<16x128xf32>
    %5 = arith.addf %2, %4 : vector<16x128xf32>
    %c0_5 = arith.constant 0 : index
    %c0_6 = arith.constant 0 : index
    %6 = vector.load %arg5[%c0_5, %c0_6] : memref<16x128xf32, #tpu.memory_space<vmem>>, vector<16x128xf32>
    tpu.vector_store %arg5[%c0_5, %c0_6], %5 {strides = array<i32>} : memref<16x128xf32, #tpu.memory_space<vmem>>, vector<16x128xf32>,
    return
  }
  func.func @transform_0(%arg0: i32, %arg1: i32) -> (i32, i32) {
    %c0_i32 = arith.constant 0 : i32
    %c0_i32_0 = arith.constant 0 : i32
    return %arg0, %c0_i32 : i32, i32
  }
  func.func @transform_1(%arg0: i32, %arg1: i32) -> (i32, i32) {
    %c0_i32 = arith.constant 0 : i32
    %c0_i32_0 = arith.constant 0 : i32
    return %c0_i32, %arg1 : i32, i32
  }
  func.func @transform_2(%arg0: i32, %arg1: i32) -> (i32, i32) {
    %c0_i32 = arith.constant 0 : i32
    %c0_i32_0 = arith.constant 0 : i32
    return %c0_i32, %arg1 : i32, i32
  }
  func.func @transform_3(%arg0: i32, %arg1: i32) -> (i32, i32) {
    %c0_i32 = arith.constant 0 : i32
    return %arg0, %arg1 : i32, i32
  }
}

</mosaic_0001>

<bundles_post_ra>
// kernel: composite_qkv_map.1
= control target key start
LH: loop header
LB: loop body
LE: loop exit
PB: predicated region body
PF: predicated region fallthrough
CT: control target
= control target key end

     0   :  { %vm27_vm0 = vcmask 261120   ;;  %s184_s1 = inlined_call_operand.vmem [shape: f32[32,128], index: 1, kind: input, shape index: {}]   ;;  %s185_s0 = inlined_call_operand.vmem [shape: f32[16,32], index: 0, kind: input, shape index: {}]   ;;  %s186_s2 = inlined_call_operand.vmem [shape: f32[1,128], index: 2, kind: input, shape index: {}]   ;;  %s187_s3 = inlined_call_operand.vmem [shape: f32[16,128], index: 3, kind: output, shape index: {}]  }
   0x1   :  { %v19_v0 = vld [vmem:[%s184_s1 + $0x18] sm:$0xff]  ;;  %v18_v1 = vld [vmem:[%s184_s1 + $0x10] sm:$0xff]  ;;  %v14_v2 = vld [vmem:[%s185_s0] sm:$0xff] }
   0x2   :  { %124 = vmatprep.subr.mxu0 %v19_v0  ;;  %v17_v3 = vld [vmem:[%s184_s1 + $0x8] sm:$0xff]  ;;  %132 = vmatprep.mubr.msk.f32.mxu0 %vm27_vm0, %v14_v2  ;;  %v16_v4 = vld [vmem:[%s184_s1] sm:$0xff] }
   0x3   :  { %125 = vmatpush3.msra.mxu0 %v19_v0  ;;  %v15_v5 = vld [vmem:[%s185_s0 + $0x8] sm:$0xff]  ;;  %v115_v6 = vld [vmem:[%s186_s2] ss:$0 sm:$0xff] }
   0x4   :  { %126 = vmatprep.subr.mxu0 %v18_v1 }
   0x5   :  { %127 = vmatpush3.msra.mxu0 %v18_v1 }
   0x6   :  { %128 = vmatprep.subr.mxu0 %v17_v3 }
   0x7   :  { %129 = vmatpush3.msra.mxu0 %v17_v3 }
   0x8   :  { %130 = vmatprep.subr.mxu0 %v16_v4 }
   0x9   :  { %131 = vmatpush3.msra.mxu0 %v16_v4 }
   0xa   :  { %133 = vmatmul.mubr.msk.f32.vlgmr.msra.gmra.mxu0 %vm27_vm0, %v15_v5 }
  0xca   :  { %v134_v7 = vpop.f32.mrf.mxu0 }
  0xcb   :  { %v106_v8 = vadd.f32 %v134_v7, %v115_v6 }
  0xcc   :  { %v100_v9 = vpop.f32.mrf.mxu0 }
  0xcd   :  { %110 = vst [vmem:[%s187_s3 + $0x8] sm:$0xff] %v106_v8  ;;  %v101_v10 = vadd.f32 %v115_v6, %v100_v9 }
  0xcf   :  { %109 = vst [vmem:[%s187_s3] sm:$0xff] %v101_v10 }

</bundles_post_ra>
